<compile_context>
chip_gen: v5e
topology: v5e:2x2
jax: 0.10.0
libtpu: 0.0.40
codegen_flags: <defaults>
</compile_context>

<pallas_src>
import functools

import numpy as np
import jax
import jax.numpy as jnp
from jax.experimental import pallas as pl
from jax.experimental.pallas import tpu as pltpu


def _pool_kernel(x_ref, o_ref, rowsum_ref, *, P: int, T: int, k: int, m: int):
    # x_ref:      (m*k*P, tH) — m contiguous pooling row-groups, one batch
    #             element, one hidden tile.  Input rows are patches in
    #             row-major order p = i*P + j (i = patch row, j = patch col).
    # o_ref:      (m*T, tH)   — pooled tokens for those row-groups.
    # rowsum_ref: (P, tH) f32 scratch, reused per row-group.
    scale = 1.0 / float(k * k)

    for g in range(m):
        base = g * k * P

        # Stage A: contiguous, sublane-aligned reduction over the patch-row
        # axis (di).  rowsum[j] = sum_di x[(ti*k + di)*P + j], accumulated in
        # f32 as a register value, stored once to scratch.
        rowsum = x_ref[base:base + P, :].astype(jnp.float32)
        for di in range(1, k):
            rowsum = rowsum + x_ref[base + di * P:base + (di + 1) * P, :].astype(jnp.float32)
        rowsum_ref[...] = rowsum

        # Stage B: stride-k reduction over the patch-column axis (dj) on the
        # k*k-times-smaller f32 intermediate (unpacked f32 -> no packed-bf16
        # sublane-slice issues).  out[tj] = sum_dj rowsum[tj*k + dj].
        acc = rowsum_ref[pl.ds(0, T, stride=k), :]
        for dj in range(1, k):
            acc = acc + rowsum_ref[pl.ds(dj, T, stride=k), :]

        o_ref[g * T:(g + 1) * T, :] = (acc * scale).astype(o_ref.dtype)


def _pick_hidden_tile(H: int) -> int:
    # Lane-dim tile: must be a multiple of 128 or the full extent.  Prefer a
    # few hundred lanes (e.g. Gemma3 H=1152 -> 384) so per-step blocks stay in
    # the low-MB range; never grow toward full H for large H.
    if H % 128 != 0:
        return H
    for cand in (512, 384, 256, 128):
        if H % cand == 0:
            return cand
    return H


def _choose_row_groups(P: int, T: int, k: int, B: int, n_h: int, tH: int, itemsize: int) -> int:
    # m = pooling row-groups per block.  Legality: m divides T; block row
    # counts (m*k*P input, m*T output) must be multiples of 8 or full extents.
    valid = [
        m for m in range(1, T + 1)
        if T % m == 0
        and ((m * T) % 8 == 0 or m * T == T * T)
        and ((m * k * P) % 8 == 0 or m * k * P == P * P)
    ]
    if not valid:
        return T  # full-extent blocks are always legal

    max_block = 6 * (1 << 20)  # keep per-step blocks well under scoped VMEM
    # Prefer the largest m (fewest, biggest blocks -> lowest fixed overhead,
    # good for v5e's slower HBM) that still leaves >= 8 total grid steps to
    # hide the prologue and split evenly across v7x's two cores.
    for m in sorted(valid, reverse=True):
        steps = B * (T // m) * n_h
        if steps >= 8 and m * k * P * tH * itemsize <= max_block:
            return m
    # Tiny problems that cannot reach 8 steps: just take the largest block
    # that stays modest.
    for m in sorted(valid, reverse=True):
        if m * k * P * tH * itemsize <= max_block:
            return m
    return min(valid)


def gemma3_mm_pool(x: jnp.ndarray, patches_per_image: int, tokens_per_side: int) -> jnp.ndarray:
    """x: (B, P*P, H) -> (B, T*T, H), matching Gemma3MMPool.forward."""
    B, num_patches, H = x.shape
    P = patches_per_image
    T = tokens_per_side
    assert num_patches == P * P, "second dim must be patches_per_image**2"
    assert P % T == 0, "patches_per_image must be divisible by tokens_per_side"
    k = P // T

    itemsize = jnp.dtype(x.dtype).itemsize
    tH = _pick_hidden_tile(H)
    n_h = H // tH
    m = _choose_row_groups(P, T, k, B, n_h, tH, itemsize)
    n_chunks = T // m

    grid = (B, n_chunks, n_h)
    kernel = functools.partial(_pool_kernel, P=P, T=T, k=k, m=m)

    cost = pl.CostEstimate(
        flops=int(B * H * (P * P + T * T)),           # ~P*P adds + T*T muls per lane
        transcendentals=0,
        bytes_accessed=int(B * H * (P * P + T * T) * itemsize),
    )

    return pl.pallas_call(
        kernel,
        out_shape=jax.ShapeDtypeStruct((B, T * T, H), x.dtype),
        grid=grid,
        in_specs=[
            # batch squeezed; m row-groups of the patch axis; one hidden tile
            pl.BlockSpec((None, m * k * P, tH), lambda b, c, h: (b, c, h)),
        ],
        out_specs=pl.BlockSpec((None, m * T, tH), lambda b, c, h: (b, c, h)),
        scratch_shapes=[pltpu.VMEM((P, tH), jnp.float32)],
        compiler_params=pltpu.CompilerParams(
            dimension_semantics=("parallel", "parallel", "parallel"),
        ),
        cost_estimate=cost,
    )(x)


def _reference(x, P, T):
    # pure-JAX reference mirroring the torch code
    B, _, H = x.shape
    k = P // T
    xr = jnp.transpose(x, (0, 2, 1)).reshape(B, H, P, P)          # NCHW
    xr = xr.reshape(B, H, T, k, T, k).mean(axis=(3, 5))           # avg_pool2d
    return jnp.transpose(xr.reshape(B, H, T * T), (0, 2, 1))      # (B, T*T, H)


if __name__ == "__main__":
    # Case 1: small module-consistent shapes (full-H lane block, single chunk).
    B, P, T, H = 2, 16, 4, 32
    x1 = jax.random.normal(jax.random.PRNGKey(0), (B, P * P, H), dtype=jnp.float32)
    out1 = jax.block_until_ready(gemma3_mm_pool(x1, patches_per_image=P, tokens_per_side=T))
    ref1 = _reference(x1, P, T)
    assert out1.shape == (B, T * T, H), out1.shape
    assert np.allclose(np.asarray(out1), np.asarray(ref1), atol=1e-5, rtol=1e-5)

    # Case 2: exercises BOTH the hidden tiling (tH=384 -> 2 tiles) and the new
    # patch-axis chunking (m=2 row-groups/block -> 2 chunks), grid = (2,2,2).
    B, P, T, H = 2, 16, 4, 768
    x2 = jax.random.normal(jax.random.PRNGKey(0), (B, P * P, H), dtype=jnp.float32)
    out2 = jax.block_until_ready(gemma3_mm_pool(x2, patches_per_image=P, tokens_per_side=T))
    ref2 = _reference(x2, P, T)
    assert out2.shape == (B, T * T, H), out2.shape
    assert np.allclose(np.asarray(out2), np.asarray(ref2), atol=1e-5, rtol=1e-5)

    # Case 3: bf16 activations (the real Gemma3 path) through the same tiled
    # kernel; accumulation stays f32 in-kernel, only the final store is bf16.
    B, P, T, H = 2, 16, 4, 768
    x3 = jax.random.normal(jax.random.PRNGKey(0), (B, P * P, H), dtype=jnp.float32).astype(jnp.bfloat16)
    out3 = jax.block_until_ready(gemma3_mm_pool(x3, patches_per_image=P, tokens_per_side=T))
    ref3 = _reference(x3.astype(jnp.float32), P, T)
    assert out3.shape == (B, T * T, H), out3.shape
    assert np.allclose(np.asarray(out3, dtype=np.float32), np.asarray(ref3), atol=1e-2, rtol=1e-2)

    print("KERNEL_OK")
</pallas_src>

<mosaic_0001>
module attributes {stable_mosaic.version = 11 : i64} {
  func.func @_pool_kernel(%arg0: i32, %arg1: i32, %arg2: i32, %arg3: memref<1x256x32xf32, #tpu.memory_space<vmem>>, %arg4: memref<1x16x32xf32, #tpu.memory_space<vmem>>, %arg5: memref<16x32xf32, #tpu.memory_space<vmem>>) attributes {dimension_semantics = [#tpu.dimension_semantics<parallel>, #tpu.dimension_semantics<parallel>, #tpu.dimension_semantics<parallel>], iteration_bounds = array<i64: 2, 1, 1>, scalar_prefetch = 0 : i64, scratch_operands = 1 : i64, tpu.core_type = #tpu.core_type<tc>, window_params = [{transform_indices = @transform_0, window_bounds = array<i64: 1, 256, 32>}, {transform_indices = @transform_1, window_bounds = array<i64: 1, 16, 32>}]} {
    %c0 = arith.constant 0 : index
    %c0_0 = arith.constant 0 : index
    %c0_1 = arith.constant 0 : index
    %0 = vector.load %arg3[%c0, %c0_0, %c0_1] : memref<1x256x32xf32, #tpu.memory_space<vmem>>, vector<1x16x32xf32>
    %1 = vector.shape_cast %0 : vector<1x16x32xf32> to vector<16x32xf32>
    %c0_2 = arith.constant 0 : index
    %c16 = arith.constant 16 : index
    %c0_3 = arith.constant 0 : index
    %2 = vector.load %arg3[%c0_2, %c16, %c0_3] : memref<1x256x32xf32, #tpu.memory_space<vmem>>, vector<1x16x32xf32>
    %3 = vector.shape_cast %2 : vector<1x16x32xf32> to vector<16x32xf32>
    %4 = arith.addf %1, %3 : vector<16x32xf32>
    %c0_4 = arith.constant 0 : index
    %c32 = arith.constant 32 : index
    %c0_5 = arith.constant 0 : index
    %5 = vector.load %arg3[%c0_4, %c32, %c0_5] : memref<1x256x32xf32, #tpu.memory_space<vmem>>, vector<1x16x32xf32>
    %6 = vector.shape_cast %5 : vector<1x16x32xf32> to vector<16x32xf32>
    %7 = arith.addf %4, %6 : vector<16x32xf32>
    %c0_6 = arith.constant 0 : index
    %c48 = arith.constant 48 : index
    %c0_7 = arith.constant 0 : index
    %8 = vector.load %arg3[%c0_6, %c48, %c0_7] : memref<1x256x32xf32, #tpu.memory_space<vmem>>, vector<1x16x32xf32>
    %9 = vector.shape_cast %8 : vector<1x16x32xf32> to vector<16x32xf32>
    %10 = arith.addf %7, %9 : vector<16x32xf32>
    %c0_8 = arith.constant 0 : index
    %c0_9 = arith.constant 0 : index
    %11 = vector.load %arg5[%c0_8, %c0_9] : memref<16x32xf32, #tpu.memory_space<vmem>>, vector<16x32xf32>
    tpu.vector_store %arg5[%c0_8, %c0_9], %10 {strides = array<i32>} : memref<16x32xf32, #tpu.memory_space<vmem>>, vector<16x32xf32>,
    %c0_10 = arith.constant 0 : index
    %c0_11 = arith.constant 0 : index
    %12 = tpu.strided_load %arg5[%c0_10, %c0_11] {strides = array<i32: 4, 1>} : memref<16x32xf32, #tpu.memory_space<vmem>>, vector<4x32xf32>
    %c1 = arith.constant 1 : index
    %c0_12 = arith.constant 0 : index
    %13 = tpu.strided_load %arg5[%c1, %c0_12] {strides = array<i32: 4, 1>} : memref<16x32xf32, #tpu.memory_space<vmem>>, vector<4x32xf32>
    %14 = arith.addf %12, %13 : vector<4x32xf32>
    %c2 = arith.constant 2 : index
    %c0_13 = arith.constant 0 : index
    %15 = tpu.strided_load %arg5[%c2, %c0_13] {strides = array<i32: 4, 1>} : memref<16x32xf32, #tpu.memory_space<vmem>>, vector<4x32xf32>
    %16 = arith.addf %14, %15 : vector<4x32xf32>
    %c3 = arith.constant 3 : index
    %c0_14 = arith.constant 0 : index
    %17 = tpu.strided_load %arg5[%c3, %c0_14] {strides = array<i32: 4, 1>} : memref<16x32xf32, #tpu.memory_space<vmem>>, vector<4x32xf32>
    %18 = arith.addf %16, %17 : vector<4x32xf32>
    %cst = arith.constant 6.250000e-02 : f32
    %19 = vector.broadcast %cst : f32 to vector<4x32xf32>
    %20 = arith.mulf %18, %19 : vector<4x32xf32>
    %c0_15 = arith.constant 0 : index
    %c0_16 = arith.constant 0 : index
    %c0_17 = arith.constant 0 : index
    %21 = vector.load %arg4[%c0_15, %c0_16, %c0_17] : memref<1x16x32xf32, #tpu.memory_space<vmem>>, vector<1x4x32xf32>
    %22 = vector.shape_cast %21 : vector<1x4x32xf32> to vector<4x32xf32>
    %23 = vector.shape_cast %20 : vector<4x32xf32> to vector<1x4x32xf32>
    tpu.vector_store %arg4[%c0_15, %c0_16, %c0_17], %23 {strides = array<i32>} : memref<1x16x32xf32, #tpu.memory_space<vmem>>, vector<1x4x32xf32>,
    %c0_18 = arith.constant 0 : index
    %c64 = arith.constant 64 : index
    %c0_19 = arith.constant 0 : index
    %24 = vector.load %arg3[%c0_18, %c64, %c0_19] : memref<1x256x32xf32, #tpu.memory_space<vmem>>, vector<1x16x32xf32>
    %25 = vector.shape_cast %24 : vector<1x16x32xf32> to vector<16x32xf32>
    %c0_20 = arith.constant 0 : index
    %c80 = arith.constant 80 : index
    %c0_21 = arith.constant 0 : index
    %26 = vector.load %arg3[%c0_20, %c80, %c0_21] : memref<1x256x32xf32, #tpu.memory_space<vmem>>, vector<1x16x32xf32>
    %27 = vector.shape_cast %26 : vector<1x16x32xf32> to vector<16x32xf32>
    %28 = arith.addf %25, %27 : vector<16x32xf32>
    %c0_22 = arith.constant 0 : index
    %c96 = arith.constant 96 : index
    %c0_23 = arith.constant 0 : index
    %29 = vector.load %arg3[%c0_22, %c96, %c0_23] : memref<1x256x32xf32, #tpu.memory_space<vmem>>, vector<1x16x32xf32>
    %30 = vector.shape_cast %29 : vector<1x16x32xf32> to vector<16x32xf32>
    %31 = arith.addf %28, %30 : vector<16x32xf32>
    %c0_24 = arith.constant 0 : index
    %c112 = arith.constant 112 : index
    %c0_25 = arith.constant 0 : index
    %32 = vector.load %arg3[%c0_24, %c112, %c0_25] : memref<1x256x32xf32, #tpu.memory_space<vmem>>, vector<1x16x32xf32>
    %33 = vector.shape_cast %32 : vector<1x16x32xf32> to vector<16x32xf32>
    %34 = arith.addf %31, %33 : vector<16x32xf32>
    %c0_26 = arith.constant 0 : index
    %c0_27 = arith.constant 0 : index
    %35 = vector.load %arg5[%c0_26, %c0_27] : memref<16x32xf32, #tpu.memory_space<vmem>>, vector<16x32xf32>
    tpu.vector_store %arg5[%c0_26, %c0_27], %34 {strides = array<i32>} : memref<16x32xf32, #tpu.memory_space<vmem>>, vector<16x32xf32>,
    %c0_28 = arith.constant 0 : index
    %c0_29 = arith.constant 0 : index
    %36 = tpu.strided_load %arg5[%c0_28, %c0_29] {strides = array<i32: 4, 1>} : memref<16x32xf32, #tpu.memory_space<vmem>>, vector<4x32xf32>
    %c1_30 = arith.constant 1 : index
    %c0_31 = arith.constant 0 : index
    %37 = tpu.strided_load %arg5[%c1_30, %c0_31] {strides = array<i32: 4, 1>} : memref<16x32xf32, #tpu.memory_space<vmem>>, vector<4x32xf32>
    %38 = arith.addf %36, %37 : vector<4x32xf32>
    %c2_32 = arith.constant 2 : index
    %c0_33 = arith.constant 0 : index
    %39 = tpu.strided_load %arg5[%c2_32, %c0_33] {strides = array<i32: 4, 1>} : memref<16x32xf32, #tpu.memory_space<vmem>>, vector<4x32xf32>
    %40 = arith.addf %38, %39 : vector<4x32xf32>
    %c3_34 = arith.constant 3 : index
    %c0_35 = arith.constant 0 : index
    %41 = tpu.strided_load %arg5[%c3_34, %c0_35] {strides = array<i32: 4, 1>} : memref<16x32xf32, #tpu.memory_space<vmem>>, vector<4x32xf32>
    %42 = arith.addf %40, %41 : vector<4x32xf32>
    %cst_36 = arith.constant 6.250000e-02 : f32
    %43 = vector.broadcast %cst_36 : f32 to vector<4x32xf32>
    %44 = arith.mulf %42, %43 : vector<4x32xf32>
    %c0_37 = arith.constant 0 : index
    %c4 = arith.constant 4 : index
    %c0_38 = arith.constant 0 : index
    %45 = vector.load %arg4[%c0_37, %c4, %c0_38] : memref<1x16x32xf32, #tpu.memory_space<vmem>>, vector<1x4x32xf32>
    %46 = vector.shape_cast %45 : vector<1x4x32xf32> to vector<4x32xf32>
    %47 = vector.shape_cast %44 : vector<4x32xf32> to vector<1x4x32xf32>
    tpu.vector_store %arg4[%c0_37, %c4, %c0_38], %47 {strides = array<i32>} : memref<1x16x32xf32, #tpu.memory_space<vmem>>, vector<1x4x32xf32>,
    %c0_39 = arith.constant 0 : index
    %c128 = arith.constant 128 : index
    %c0_40 = arith.constant 0 : index
    %48 = vector.load %arg3[%c0_39, %c128, %c0_40] : memref<1x256x32xf32, #tpu.memory_space<vmem>>, vector<1x16x32xf32>
    %49 = vector.shape_cast %48 : vector<1x16x32xf32> to vector<16x32xf32>
    %c0_41 = arith.constant 0 : index
    %c144 = arith.constant 144 : index
    %c0_42 = arith.constant 0 : index
    %50 = vector.load %arg3[%c0_41, %c144, %c0_42] : memref<1x256x32xf32, #tpu.memory_space<vmem>>, vector<1x16x32xf32>
    %51 = vector.shape_cast %50 : vector<1x16x32xf32> to vector<16x32xf32>
    %52 = arith.addf %49, %51 : vector<16x32xf32>
    %c0_43 = arith.constant 0 : index
    %c160 = arith.constant 160 : index
    %c0_44 = arith.constant 0 : index
    %53 = vector.load %arg3[%c0_43, %c160, %c0_44] : memref<1x256x32xf32, #tpu.memory_space<vmem>>, vector<1x16x32xf32>
    %54 = vector.shape_cast %53 : vector<1x16x32xf32> to vector<16x32xf32>
    %55 = arith.addf %52, %54 : vector<16x32xf32>
    %c0_45 = arith.constant 0 : index
    %c176 = arith.constant 176 : index
    %c0_46 = arith.constant 0 : index
    %56 = vector.load %arg3[%c0_45, %c176, %c0_46] : memref<1x256x32xf32, #tpu.memory_space<vmem>>, vector<1x16x32xf32>
    %57 = vector.shape_cast %56 : vector<1x16x32xf32> to vector<16x32xf32>
    %58 = arith.addf %55, %57 : vector<16x32xf32>
    %c0_47 = arith.constant 0 : index
    %c0_48 = arith.constant 0 : index
    %59 = vector.load %arg5[%c0_47, %c0_48] : memref<16x32xf32, #tpu.memory_space<vmem>>, vector<16x32xf32>
    tpu.vector_store %arg5[%c0_47, %c0_48], %58 {strides = array<i32>} : memref<16x32xf32, #tpu.memory_space<vmem>>, vector<16x32xf32>,
    %c0_49 = arith.constant 0 : index
    %c0_50 = arith.constant 0 : index
    %60 = tpu.strided_load %arg5[%c0_49, %c0_50] {strides = array<i32: 4, 1>} : memref<16x32xf32, #tpu.memory_space<vmem>>, vector<4x32xf32>
    %c1_51 = arith.constant 1 : index
    %c0_52 = arith.constant 0 : index
    %61 = tpu.strided_load %arg5[%c1_51, %c0_52] {strides = array<i32: 4, 1>} : memref<16x32xf32, #tpu.memory_space<vmem>>, vector<4x32xf32>
    %62 = arith.addf %60, %61 : vector<4x32xf32>
    %c2_53 = arith.constant 2 : index
    %c0_54 = arith.constant 0 : index
    %63 = tpu.strided_load %arg5[%c2_53, %c0_54] {strides = array<i32: 4, 1>} : memref<16x32xf32, #tpu.memory_space<vmem>>, vector<4x32xf32>
    %64 = arith.addf %62, %63 : vector<4x32xf32>
    %c3_55 = arith.constant 3 : index
    %c0_56 = arith.constant 0 : index
    %65 = tpu.strided_load %arg5[%c3_55, %c0_56] {strides = array<i32: 4, 1>} : memref<16x32xf32, #tpu.memory_space<vmem>>, vector<4x32xf32>
    %66 = arith.addf %64, %65 : vector<4x32xf32>
    %cst_57 = arith.constant 6.250000e-02 : f32
    %67 = vector.broadcast %cst_57 : f32 to vector<4x32xf32>
    %68 = arith.mulf %66, %67 : vector<4x32xf32>
    %c0_58 = arith.constant 0 : index
    %c8 = arith.constant 8 : index
    %c0_59 = arith.constant 0 : index
    %69 = vector.load %arg4[%c0_58, %c8, %c0_59] : memref<1x16x32xf32, #tpu.memory_space<vmem>>, vector<1x4x32xf32>
    %70 = vector.shape_cast %69 : vector<1x4x32xf32> to vector<4x32xf32>
    %71 = vector.shape_cast %68 : vector<4x32xf32> to vector<1x4x32xf32>
    tpu.vector_store %arg4[%c0_58, %c8, %c0_59], %71 {strides = array<i32>} : memref<1x16x32xf32, #tpu.memory_space<vmem>>, vector<1x4x32xf32>,
    %c0_60 = arith.constant 0 : index
    %c192 = arith.constant 192 : index
    %c0_61 = arith.constant 0 : index
    %72 = vector.load %arg3[%c0_60, %c192, %c0_61] : memref<1x256x32xf32, #tpu.memory_space<vmem>>, vector<1x16x32xf32>
    %73 = vector.shape_cast %72 : vector<1x16x32xf32> to vector<16x32xf32>
    %c0_62 = arith.constant 0 : index
    %c208 = arith.constant 208 : index
    %c0_63 = arith.constant 0 : index
    %74 = vector.load %arg3[%c0_62, %c208, %c0_63] : memref<1x256x32xf32, #tpu.memory_space<vmem>>, vector<1x16x32xf32>
    %75 = vector.shape_cast %74 : vector<1x16x32xf32> to vector<16x32xf32>
    %76 = arith.addf %73, %75 : vector<16x32xf32>
    %c0_64 = arith.constant 0 : index
    %c224 = arith.constant 224 : index
    %c0_65 = arith.constant 0 : index
    %77 = vector.load %arg3[%c0_64, %c224, %c0_65] : memref<1x256x32xf32, #tpu.memory_space<vmem>>, vector<1x16x32xf32>
    %78 = vector.shape_cast %77 : vector<1x16x32xf32> to vector<16x32xf32>
    %79 = arith.addf %76, %78 : vector<16x32xf32>
    %c0_66 = arith.constant 0 : index
    %c240 = arith.constant 240 : index
    %c0_67 = arith.constant 0 : index
    %80 = vector.load %arg3[%c0_66, %c240, %c0_67] : memref<1x256x32xf32, #tpu.memory_space<vmem>>, vector<1x16x32xf32>
    %81 = vector.shape_cast %80 : vector<1x16x32xf32> to vector<16x32xf32>
    %82 = arith.addf %79, %81 : vector<16x32xf32>
    %c0_68 = arith.constant 0 : index
    %c0_69 = arith.constant 0 : index
    %83 = vector.load %arg5[%c0_68, %c0_69] : memref<16x32xf32, #tpu.memory_space<vmem>>, vector<16x32xf32>
    tpu.vector_store %arg5[%c0_68, %c0_69], %82 {strides = array<i32>} : memref<16x32xf32, #tpu.memory_space<vmem>>, vector<16x32xf32>,
    %c0_70 = arith.constant 0 : index
    %c0_71 = arith.constant 0 : index
    %84 = tpu.strided_load %arg5[%c0_70, %c0_71] {strides = array<i32: 4, 1>} : memref<16x32xf32, #tpu.memory_space<vmem>>, vector<4x32xf32>
    %c1_72 = arith.constant 1 : index
    %c0_73 = arith.constant 0 : index
    %85 = tpu.strided_load %arg5[%c1_72, %c0_73] {strides = array<i32: 4, 1>} : memref<16x32xf32, #tpu.memory_space<vmem>>, vector<4x32xf32>
    %86 = arith.addf %84, %85 : vector<4x32xf32>
    %c2_74 = arith.constant 2 : index
    %c0_75 = arith.constant 0 : index
    %87 = tpu.strided_load %arg5[%c2_74, %c0_75] {strides = array<i32: 4, 1>} : memref<16x32xf32, #tpu.memory_space<vmem>>, vector<4x32xf32>
    %88 = arith.addf %86, %87 : vector<4x32xf32>
    %c3_76 = arith.constant 3 : index
    %c0_77 = arith.constant 0 : index
    %89 = tpu.strided_load %arg5[%c3_76, %c0_77] {strides = array<i32: 4, 1>} : memref<16x32xf32, #tpu.memory_space<vmem>>, vector<4x32xf32>
    %90 = arith.addf %88, %89 : vector<4x32xf32>
    %cst_78 = arith.constant 6.250000e-02 : f32
    %91 = vector.broadcast %cst_78 : f32 to vector<4x32xf32>
    %92 = arith.mulf %90, %91 : vector<4x32xf32>
    %c0_79 = arith.constant 0 : index
    %c12 = arith.constant 12 : index
    %c0_80 = arith.constant 0 : index
    %93 = vector.load %arg4[%c0_79, %c12, %c0_80] : memref<1x16x32xf32, #tpu.memory_space<vmem>>, vector<1x4x32xf32>
    %94 = vector.shape_cast %93 : vector<1x4x32xf32> to vector<4x32xf32>
    %95 = vector.shape_cast %92 : vector<4x32xf32> to vector<1x4x32xf32>
    tpu.vector_store %arg4[%c0_79, %c12, %c0_80], %95 {strides = array<i32>} : memref<1x16x32xf32, #tpu.memory_space<vmem>>, vector<1x4x32xf32>,
    return
  }
  func.func @transform_0(%arg0: i32, %arg1: i32, %arg2: i32) -> (i32, i32, i32) {
    %c0_i32 = arith.constant 0 : i32
    return %arg0, %arg1, %arg2 : i32, i32, i32
  }
  func.func @transform_1(%arg0: i32, %arg1: i32, %arg2: i32) -> (i32, i32, i32) {
    %c0_i32 = arith.constant 0 : i32
    return %arg0, %arg1, %arg2 : i32, i32, i32
  }
}

</mosaic_0001>

<bundles_post_ra>
// kernel: tpu_custom_call.1
= control target key start
LH: loop header
LB: loop body
LE: loop exit
PB: predicated region body
PF: predicated region fallthrough
CT: control target
= control target key end

     0   :  { %6 = vsyncpa [#allocation4], 0  ;;  %s694_s0 = inlined_call_operand.vmem [shape: f32[2,256,32], index: 0, kind: input, shape index: {}]   ;;  %s695_s1 = inlined_call_operand.hbm [shape: f32[2,16,32], index: 1, kind: output, shape index: {}]  }
   0x1   :  { %8 = vsyncpa [#allocation4 + $0x1], 0  ;;  %s540_s6 = smov 0   ;;  %s542_s7 = smov 0  }
   0x2   :  { %s544_s8 = smov 0   ;;  %s546_s9 = smov 0  }
   0x3   :  { %s548_s10 = smov 0   ;;  %s550_s11 = smov 0  }
   0x4 LB: > { %s376_s12 = sadd.s32 4294967295, %s526_s11   ;;  %s377_s13 = sadd.s32 4294967294, %s526_s11   ;;  %s526_s11 = sphi %s550_s11, %s14_s11   ;;  %s522_s10 = sphi %s548_s10, %s702_s10   ;;  %s518_s9 = sphi %s546_s9, %s701_s9   ;;  %s514_s8 = sphi %s544_s8, %s700_s8   ;;  %s510_s7 = sphi %s542_s7, %s699_s7   ;;  %s506_s6 = sphi %s540_s6, %s698_s6  }
   0x5   : > { %s33_s14 = sadd.s32 1, %s522_s10  ;;  %s74_s15 = sadd.s32 1, %s514_s8 }
   0x6   : > { %p35_p0 = scmp.ge.s32.totalorder %s33_s14, 2  ;;  %p84_p1 = scmp.ne.s32.totalorder %s514_s8, %s510_s7 }
   0x7   : > { %p85_p2 = scmp.eq.s32.totalorder %s376_s12, 1  ;;  %p90_p3 = scmp.ne.s32.totalorder %s510_s7, %s506_s6 }
   0x8   : > { %s704_s14 = smov (%p35_p0, %s33_s14), 0  ;;  %p91_p5 = scmp.eq.s32.totalorder %s377_s13, 1 }
   0x9   : > { %p580_p4 = por %p85_p2, %p84_p1  ;;  %s67_s17 = ssub.s32 %s522_s10, %s704_s14 }
   0xa   : > { %p380_p6 = scmp.ge.s32.totalorder %s526_s11, 1  ;;  %p72_p7 = scmp.eq.s32.totalorder %s67_s17, 0 }
   0xb   : > { %p587_p8 = por %p91_p5, %p90_p3  ;;  %p125_p9 = scmp.lt.s32.totalorder %s526_s11, 3 }
   0xc   : > { %s593_s19 = scalar_select %p72_p7, %s514_s8, %s74_s15  }
   0xd   : > { %p126_p10 = pnand %p380_p6, %p125_p9 }
   0xe   : > { %p153_p11 = scmp.lt.s32.totalorder (!%p126_p10), %s518_s9, 1  ;;  %s149_s25 = sand.u32 (!%p126_p10), 1, %s510_s7  }
   0xf   : > { %129 = sbr.rel (%p126_p10) target bundleno = 82 (0x52), region = 24  ;;  %s381_s26 = sshll.u32 (!%p126_p10), %s149_s25, 4 }
  0x10   : > { %s637_s27 = scalar_lea.vmem (!%p126_p10), [#allocation3], %s381_s26  ;;  %s390_s28 = sshll.u32 (!%p126_p10), %s518_s9, 4 }
  0x11   : > { %s286_s2 = scalar_lea.hbm (!%p126_p10), %s695_s1, %s390_s28  ;;  %s287_s3 = sshll.u32 (!%p126_p10), %s637_s27, 4  ;;  %s288_s3 = int_to_ptr.vmem [resolvable:$true] %s287_s3 }
  0x12   : > { %s289_s4 = sshll.u32 (!%p126_p10), %s286_s2, 4  ;;  %s272_s5 = scalar_lea.sflag (!%p126_p10), [#allocation4], %s149_s25  ;;  %s290_s4 = int_to_ptr.hbm [resolvable:$true] %s289_s4 }
  0x13   : > { %s468_s17 = scalar_lea.hbm (!%p126_p10), %s695_s1, 32 }
  0x14   : > { %s154_s20 = scalar_select %p153_p11, %s518_s9, 1  ;;  %vm180_vm0 = vcmask 261120   ;;  %vm194_vm1 = vcmask 257024  }
  0x15   : > { %s462_s9 = sshra.s32 %s290_s4, 4  ;;  %s463_s9 = int_to_ptr.hbm [resolvable:$true] %s462_s9 }
  0x16   : > { %s389_s21 = sshll.u32 %s154_s20, 8  ;;  %s464_s12 = scalar_lea.hbm %s463_s9, 16 }
  0x17   : > { %s600_s24 = scalar_lea.vmem %s694_s0, %s389_s21  ;;  %p465_p12 = scmp.ne.s32.totalorder %s463_s9, %s464_s12 }
  0x18   : > { %v166_v0 = vld [vmem:[%s600_s24] sm:$0xff]  ;;  %v168_v1 = vld [vmem:[%s600_s24 + $0x10] sm:$0xff]  ;;  %v167_v4 = vld [vmem:[%s600_s24 + $0x8] sm:$0xff]  ;;  %p469_p1 = scmp.lt.s32.totalorder %s463_s9, %s695_s1  ;;  %p470_p2 = scmp.lt.s32.totalorder %s468_s17, %s464_s12 }
  0x19   : > { %v172_v2 = vld [vmem:[%s600_s24 + $0x20] sm:$0xff]  ;;  %v170_v3 = vadd.f32 %v168_v1, %v166_v0  ;;  %v169_v5 = vld [vmem:[%s600_s24 + $0x18] sm:$0xff]  ;;  %v176_v6 = vld [vmem:[%s600_s24 + $0x30] sm:$0xff]  ;;  %p466_p13 = pnand %p465_p12, %p580_p4 }
  0x1a   : > { %v171_v7 = vadd.f32 %v169_v5, %v167_v4  ;;  %v173_v8 = vld [vmem:[%s600_s24 + $0x28] sm:$0xff]  ;;  %v196_v9 = vld [vmem:[%s600_s24 + $0x40] sm:$0xff]  ;;  %v177_v11 = vld [vmem:[%s600_s24 + $0x38] sm:$0xff]  ;;  %p471_p3 = por %p470_p2, %p469_p1 }
  0x1b   : > { %v174_v10 = vadd.f32 %v172_v2, %v170_v3  ;;  %v198_v12 = vld [vmem:[%s600_s24 + $0x50] sm:$0xff]  ;;  %v197_v14 = vld [vmem:[%s600_s24 + $0x48] sm:$0xff]  ;;  %v199_v15 = vld [vmem:[%s600_s24 + $0x58] sm:$0xff]  ;;  %p467_p0 = pneg %p466_p13 }
  0x1c   : > { %v175_v13 = vadd.f32 %v173_v8, %v171_v7  ;;  %v200_v17 = vadd.f32 %v198_v12, %v196_v9  ;;  %v202_v19 = vld [vmem:[%s600_s24 + $0x60] sm:$0xff]  ;;  %v201_v20 = vadd.f32 %v199_v15, %v197_v14  ;;  %v203_v21 = vld [vmem:[%s600_s24 + $0x68] sm:$0xff]  ;;  %v206_v23 = vld [vmem:[%s600_s24 + $0x70] sm:$0xff] }
  0x1d   : > { %v178_v16 = vadd.f32 %v176_v6, %v174_v10  ;;  %v207_v25 = vld [vmem:[%s600_s24 + $0x78] sm:$0xff]  ;;  %v221_v26 = vld [vmem:[%s600_s24 + $0x80] sm:$0xff]  ;;  %v223_v27 = vld [vmem:[%s600_s24 + $0x90] sm:$0xff]  ;;  %p472_p5 = pnand %p471_p3, %p467_p0 }
  0x1e   : > { %v179_v18 = vadd.f32 %v177_v11, %v175_v13  ;;  %v204_v22 = vadd.f32 %v202_v19, %v200_v17  ;;  %v205_v24 = vadd.f32 %v203_v21, %v201_v20  ;;  %v222_v29 = vld [vmem:[%s600_s24 + $0x88] sm:$0xff]  ;;  %v224_v30 = vld [vmem:[%s600_s24 + $0x98] sm:$0xff]  ;;  %v227_v32 = vld [vmem:[%s600_s24 + $0xa0] sm:$0xff]  ;;  %v225_v35 = vadd.f32 %v223_v27, %v221_v26 }
  0x1f   : > { %181 = vst.msk [vmem:[#allocation2] sm:$0xff] %vm180_vm0, %v178_v16  ;;  %v226_v39 = vadd.f32 %v224_v30, %v222_v29  ;;  %v228_v40 = vld [vmem:[%s600_s24 + $0xa8] sm:$0xff]  ;;  %v231_v44 = vld [vmem:[%s600_s24 + $0xb0] sm:$0xff]  ;;  %v232_v46 = vld [vmem:[%s600_s24 + $0xb8] sm:$0xff] }
  0x20   : > { %182 = vst.msk [vmem:[#allocation2 + $0x8] sm:$0xff] %vm180_vm0, %v179_v18  ;;  %v208_v28 = vadd.f32 %v206_v23, %v204_v22  ;;  %v209_v31 = vadd.f32 %v207_v25, %v205_v24  ;;  %v229_v42 = vadd.f32 %v227_v32, %v225_v35  ;;  %v246_v48 = vld [vmem:[%s600_s24 + $0xc0] sm:$0xff]  ;;  %v248_v49 = vld [vmem:[%s600_s24 + $0xd0] sm:$0xff]  ;;  %v247_v51 = vld [vmem:[%s600_s24 + $0xc8] sm:$0xff] }
  0x21   : > { %v230_v45 = vadd.f32 %v228_v40, %v226_v39  ;;  %v249_v52 = vld [vmem:[%s600_s24 + $0xd8] sm:$0xff]  ;;  %v252_v54 = vld [vmem:[%s600_s24 + $0xe0] sm:$0xff]  ;;  %v250_v57 = vadd.f32 %v248_v49, %v246_v48  ;;  %v253_v62 = vld [vmem:[%s600_s24 + $0xe8] sm:$0xff] }
  0x22   : > { %v233_v50 = vadd.f32 %v231_v44, %v229_v42  ;;  %v251_v61 = vadd.f32 %v249_v52, %v247_v51  ;;  %v256_v2 = vld [vmem:[%s600_s24 + $0xf0] sm:$0xff]  ;;  %v257_v4 = vld [vmem:[%s600_s24 + $0xf8] sm:$0xff] }
  0x23   : > { %v234_v53 = vadd.f32 %v232_v46, %v230_v45  ;;  %v254_v0 = vadd.f32 %v252_v54, %v250_v57 }
  0x24   : > { %v255_v3 = vadd.f32 %v253_v62, %v251_v61 }
  0x25   : > { %v258_v6 = vadd.f32 %v256_v2, %v254_v0 }
  0x26   : > { %v259_v7 = vadd.f32 %v257_v4, %v255_v3 }
  0x27   : > { %v183_v33 = vld [vmem:[#allocation2] ss:$4 sm:$0xf]  ;;  %v185_v34 = vld [vmem:[#allocation2 + $0x1] ss:$4 sm:$0xf] }
  0x28   : > { %v188_v36 = vld [vmem:[#allocation2 + $0x2] ss:$4 sm:$0xf]  ;;  %v191_v37 = vld [vmem:[#allocation2 + $0x3] ss:$4 sm:$0xf]  ;;  %v186_v38 = vadd.f32 %v185_v34, %v183_v33 }
  0x29   : > { %210 = vst.msk [vmem:[#allocation2] sm:$0xff] %vm180_vm0, %v208_v28 }
  0x2a   : > { %211 = vst.msk [vmem:[#allocation2 + $0x8] sm:$0xff] %vm180_vm0, %v209_v31  ;;  %v189_v41 = vadd.f32 %v188_v36, %v186_v38 }
  0x2c   : > { %v192_v43 = vadd.f32 %v191_v37, %v189_v41 }
  0x2e   : > { %v193_v47 = vmul.f32 0.0625, %v192_v43 }
  0x30   : > { %195 = vst.msk [vmem:[%s637_s27] sm:$0xf] %vm194_vm1, %v193_v47 }
  0x31   : > { %v212_v55 = vld [vmem:[#allocation2] ss:$4 sm:$0xf]  ;;  %v213_v56 = vld [vmem:[#allocation2 + $0x1] ss:$4 sm:$0xf] }
  0x32   : > { %v215_v58 = vld [vmem:[#allocation2 + $0x2] ss:$4 sm:$0xf]  ;;  %v217_v59 = vld [vmem:[#allocation2 + $0x3] ss:$4 sm:$0xf]  ;;  %v214_v60 = vadd.f32 %v213_v56, %v212_v55 }
  0x33   : > { %235 = vst.msk [vmem:[#allocation2] sm:$0xff] %vm180_vm0, %v233_v50 }
  0x34   : > { %236 = vst.msk [vmem:[#allocation2 + $0x8] sm:$0xff] %vm180_vm0, %v234_v53  ;;  %v216_v63 = vadd.f32 %v215_v58, %v214_v60 }
  0x36   : > { %v218_v1 = vadd.f32 %v217_v59, %v216_v63 }
  0x38   : > { %v219_v5 = vmul.f32 0.0625, %v218_v1 }
  0x3a   : > { %220 = vst.msk [vmem:[%s637_s27 + $0x4] sm:$0xf] %vm194_vm1, %v219_v5 }
  0x3b   : > { %v237_v8 = vld [vmem:[#allocation2] ss:$4 sm:$0xf]  ;;  %v238_v9 = vld [vmem:[#allocation2 + $0x1] ss:$4 sm:$0xf] }
  0x3c   : > { %v240_v10 = vld [vmem:[#allocation2 + $0x2] ss:$4 sm:$0xf]  ;;  %v242_v11 = vld [vmem:[#allocation2 + $0x3] ss:$4 sm:$0xf]  ;;  %v239_v12 = vadd.f32 %v238_v9, %v237_v8 }
  0x3d   : > { %260 = vst.msk [vmem:[#allocation2] sm:$0xff] %vm180_vm0, %v258_v6 }
  0x3e   : > { %261 = vst.msk [vmem:[#allocation2 + $0x8] sm:$0xff] %vm180_vm0, %v259_v7  ;;  %v241_v13 = vadd.f32 %v240_v10, %v239_v12 }
  0x40   : > { %v243_v14 = vadd.f32 %v242_v11, %v241_v13 }
  0x42   : > { %v244_v15 = vmul.f32 0.0625, %v243_v14 }
  0x44   : > { %245 = vst.msk [vmem:[%s637_s27 + $0x8] sm:$0xf] %vm194_vm1, %v244_v15 }
  0x45   : > { %v262_v16 = vld [vmem:[#allocation2] ss:$4 sm:$0xf]  ;;  %v263_v17 = vld [vmem:[#allocation2 + $0x1] ss:$4 sm:$0xf] }
  0x46   : > { %v264_v18 = vadd.f32 %v263_v17, %v262_v16  ;;  %v265_v19 = vld [vmem:[#allocation2 + $0x2] ss:$4 sm:$0xf]  ;;  %v267_v21 = vld [vmem:[#allocation2 + $0x3] ss:$4 sm:$0xf] }
  0x48   : > { %v266_v20 = vadd.f32 %v265_v19, %v264_v18 }
  0x4a   : > { %v268_v22 = vadd.f32 %v267_v21, %v266_v20 }
  0x4c   : > { %v269_v23 = vmul.f32 0.0625, %v268_v22 }
  0x4e   : > { %270 = vst.msk [vmem:[%s637_s27 + $0xc] sm:$0xf] %vm194_vm1, %v269_v23 }
  0x4f   : > { %475 = shalt.err (!%p472_p5)
}
  0x50   : > { %s528_s22 = smov 128   ;;  %s529_s23 = smov 8  }
  0x51   : > { %391 = dma.vmem_to_hbm [thread:$0]  (%p580_p4), %s288_s3, 256, %s290_s4, %s272_s5, %s528_s22, %s528_s22, %s529_s23  }
  0x52 PF: > { %p397_p6 = scmp.ge.s32.totalorder %s526_s11, 2  ;;  %s304_s24 = sand.u32 1, %s506_s6  }
  0x53   : > { %s305_s25 = scalar_lea.sflag [#allocation4], %s304_s24 }
  0x54   : > { %p394_p7 = pnand %p397_p6, %p587_p8 }
  0x56   : > { %p395_p9 = pneg %p394_p7 }
  0x58   : > { %501 = dma.done.wait (%p395_p9), %s305_s25, 256  }
  0x59   : > { %503 = vsyncadd (%p395_p9), %s305_s25, 4294967040  ;;  %s14_s11 = sadd.s32 1, %s526_s11   ;;  %s698_s6 = smov %s510_s7 }
  0x5a   : > { %p11_p10 = scmp.ge.s32.totalorder %s14_s11, 4   ;;  %s699_s7 = smov %s514_s8 }
  0x5b   : > { %s700_s8 = smov %s593_s19  ;;  %s701_s9 = smov %s522_s10 }
  0x5c   : > { %s702_s10 = smov %s704_s14  ;;  %13 = sbr.rel (!%p11_p10) target bundleno = 4 (0x4), region = 62 }
  0x61   :  { %311 = vsyncpa [#allocation4], 1 }
  0x62   :  { %313 = vsyncpa [#allocation4 + $0x1], 1 }

</bundles_post_ra>
